<compile_context>
chip_gen: v5e
topology: v5e:2x2
jax: 0.10.0
libtpu: 0.0.40
codegen_flags: <defaults>
</compile_context>

<pallas_src>
import math

import jax
import jax.numpy as jnp
from jax.experimental import pallas as pl
from jax.experimental.pallas import tpu as pltpu

_LANE = 128
_SUBLANE = 8
_PE_RESIDENT_MAX_BYTES = 4 * 1024 * 1024  # keep a resident pe plane under ~4 MiB


def _round_up(x, m):
    return ((x + m - 1) // m) * m


def _vmem_budget():
    """Per-generation scoped-VMEM limit and per-tile byte budget."""
    cap = 64 << 20  # conservative fallback (v7x per-TC capacity)
    try:
        cap = int(pltpu.get_tpu_info().vmem_capacity_bytes)
    except Exception:
        pass
    # Leave ample headroom: worst case 6 live tile buffers (x/out/pe double-
    # buffered) => tile budget = limit/8 keeps us at <= 3/4 of the limit.
    vmem_limit = min(cap // 2, 48 << 20)   # 48 MiB on v5e/v6e, 32 MiB on v7x
    tile_budget = vmem_limit // 8          # 6 MiB on v5e/v6e, 4 MiB on v7x
    return vmem_limit, tile_budget


def _pick_row_tile(rows, width, itemsize, budget):
    """Row-tile size: full extent if it fits the budget, else the largest
    multiple of 8 rows under the budget (cdiv grid handles the remainder)."""
    cap_rows = max(_SUBLANE, budget // max(1, width * itemsize))
    if rows <= cap_rows:
        return rows  # full-extent block along rows: always legal
    return max(_SUBLANE, (cap_rows // _SUBLANE) * _SUBLANE)


def _make_kernel(pe_resident, tile_rows):
    if pe_resident:
        # pe plane lives whole in VMEM; slice the current row window in-kernel.
        def kernel(x_ref, pe_ref, o_ref):
            r = pl.program_id(0)
            start = pl.multiple_of(r * tile_rows, _SUBLANE)
            o_ref[...] = x_ref[...] + pe_ref[pl.ds(start, tile_rows), :]
    else:
        # pe tiled like x; batch-innermost grid elides its DMA across b.
        def kernel(x_ref, pe_ref, o_ref):
            o_ref[...] = x_ref[...] + pe_ref[...]
    return kernel


def relative_positional_encoding(x, pe):
    """x: (B, T, D), pe: (max_len, D). Returns x + pe[:T] broadcast over batch."""
    B, T, D = x.shape
    max_len = pe.shape[0]
    if T > max_len:
        raise ValueError(f"sequence length T={T} exceeds pe max_len={max_len}")

    pe_t = pe[:T].astype(x.dtype)

    # Lane-dense layout: fold (T, D) into rows whose width is a multiple of 128.
    if D % _LANE == 0:
        R, W = T, D
    else:
        g = _LANE // math.gcd(D, _LANE)  # smallest row-group making width lane-dense
        if T % g == 0:
            R, W = T // g, g * D
        else:
            R, W = T, D  # last resort: masked partial stores (last dim = full extent)

    x2 = x.reshape(B, R, W)
    pe2 = pe_t.reshape(R, W)

    itemsize = x.dtype.itemsize
    vmem_limit, tile_budget = _vmem_budget()

    tR = _pick_row_tile(R, W, itemsize, tile_budget)
    n_row_blocks = pl.cdiv(R, tR)

    # v7x has 2 TensorCores/chip: make sure the (parallel) grid has >= 2 row
    # blocks so it can shard across cores even for small tensors.
    if n_row_blocks < 2 and R > _SUBLANE:
        tR = max(_SUBLANE, _round_up(pl.cdiv(R, 2), _SUBLANE))
        n_row_blocks = pl.cdiv(R, tR)

    # pe: resident full-extent block (one DMA total) when small and there are
    # multiple row blocks; otherwise tiled like x (DMA already elided across b).
    pe_resident = (
        n_row_blocks > 1
        and (n_row_blocks * tR * W * itemsize) <= _PE_RESIDENT_MAX_BYTES
    )
    if pe_resident:
        r_pad = n_row_blocks * tR
        if r_pad > R:
            pe2 = jnp.pad(pe2, ((0, r_pad - R), (0, 0)))
        pe_spec = pl.BlockSpec((r_pad, W), lambda r, b: (0, 0))
    else:
        pe_spec = pl.BlockSpec((tR, W), lambda r, b: (r, 0))

    kernel = _make_kernel(pe_resident, tR)

    cost = pl.CostEstimate(
        flops=B * T * D,
        transcendentals=0,
        bytes_accessed=(2 * B * T * D + T * D) * itemsize,
    )

    out = pl.pallas_call(
        kernel,
        out_shape=jax.ShapeDtypeStruct((B, R, W), x.dtype),
        grid_spec=pltpu.PrefetchScalarGridSpec(
            num_scalar_prefetch=0,
            grid=(n_row_blocks, B),  # batch innermost
            in_specs=[
                pl.BlockSpec((1, tR, W), lambda r, b: (b, r, 0)),
                pe_spec,
            ],
            out_specs=pl.BlockSpec((1, tR, W), lambda r, b: (b, r, 0)),
        ),
        compiler_params=pltpu.CompilerParams(
            dimension_semantics=("parallel", "parallel"),
            vmem_limit_bytes=vmem_limit,
        ),
        cost_estimate=cost,
        input_output_aliases={0: 0},  # x is read-modify-write; allow donation
    )(x2, pe2)

    return out.reshape(B, T, D)


if __name__ == "__main__":
    # Small, deterministic example consistent with the module:
    #   d_model = 32, max_len = 500, batch = 2, seq = 8
    B, T, d_model, max_len = 2, 8, 32, 500

    key = jax.random.PRNGKey(0)
    k_pe, k_x = jax.random.split(key)

    pe = jax.random.normal(k_pe, (max_len, d_model), dtype=jnp.float32)
    x = jax.random.normal(k_x, (B, T, d_model), dtype=jnp.float32)

    out = jax.block_until_ready(relative_positional_encoding(x, pe))

    # Reference check in plain JAX.
    ref = x + pe[:T][None, :, :]
    assert out.shape == (B, T, d_model)
    assert jnp.allclose(out, ref, atol=1e-6), "mismatch vs reference"

    print("KERNEL_OK")
</pallas_src>

<mosaic_0001>
module attributes {stable_mosaic.version = 11 : i64} {
  func.func @kernel(%arg0: i32, %arg1: i32, %arg2: memref<1x2x128xf32, #tpu.memory_space<vmem>>, %arg3: memref<2x128xf32, #tpu.memory_space<vmem>>, %arg4: memref<1x2x128xf32, #tpu.memory_space<vmem>>) attributes {dimension_semantics = [#tpu.dimension_semantics<parallel>, #tpu.dimension_semantics<parallel>], iteration_bounds = array<i64: 1, 2>, scalar_prefetch = 0 : i64, scratch_operands = 0 : i64, tpu.core_type = #tpu.core_type<tc>, window_params = [{transform_indices = @transform_0, window_bounds = array<i64: 1, 2, 128>}, {transform_indices = @transform_1, window_bounds = array<i64: 2, 128>}, {transform_indices = @transform_2, window_bounds = array<i64: 1, 2, 128>}]} {
    %c0 = arith.constant 0 : index
    %c0_0 = arith.constant 0 : index
    %c0_1 = arith.constant 0 : index
    %0 = vector.load %arg2[%c0, %c0_0, %c0_1] : memref<1x2x128xf32, #tpu.memory_space<vmem>>, vector<1x2x128xf32>
    %c0_2 = arith.constant 0 : index
    %c0_3 = arith.constant 0 : index
    %1 = vector.load %arg3[%c0_2, %c0_3] : memref<2x128xf32, #tpu.memory_space<vmem>>, vector<2x128xf32>
    %2 = vector.shape_cast %1 : vector<2x128xf32> to vector<1x2x128xf32>
    %3 = arith.addf %0, %2 : vector<1x2x128xf32>
    %c0_4 = arith.constant 0 : index
    %c0_5 = arith.constant 0 : index
    %c0_6 = arith.constant 0 : index
    %4 = vector.load %arg4[%c0_4, %c0_5, %c0_6] : memref<1x2x128xf32, #tpu.memory_space<vmem>>, vector<1x2x128xf32>
    tpu.vector_store %arg4[%c0_4, %c0_5, %c0_6], %3 {strides = array<i32>} : memref<1x2x128xf32, #tpu.memory_space<vmem>>, vector<1x2x128xf32>,
    return
  }
  func.func @transform_0(%arg0: i32, %arg1: i32) -> (i32, i32, i32) {
    %c0_i32 = arith.constant 0 : i32
    %c0_i32_0 = arith.constant 0 : i32
    return %arg1, %arg0, %c0_i32 : i32, i32, i32
  }
  func.func @transform_1(%arg0: i32, %arg1: i32) -> (i32, i32) {
    %c0_i32 = arith.constant 0 : i32
    %c0_i32_0 = arith.constant 0 : i32
    return %arg0, %c0_i32 : i32, i32
  }
  func.func @transform_2(%arg0: i32, %arg1: i32) -> (i32, i32, i32) {
    %c0_i32 = arith.constant 0 : i32
    %c0_i32_0 = arith.constant 0 : i32
    return %arg1, %arg0, %c0_i32 : i32, i32, i32
  }
}

</mosaic_0001>

<bundles_post_ra>
// kernel: tpu_custom_call.1
= control target key start
LH: loop header
LB: loop body
LE: loop exit
PB: predicated region body
PF: predicated region fallthrough
CT: control target
= control target key end

     0   :  { %7 = vsyncpa [#allocation3], 0  ;;  %s639_s0 = inlined_call_operand.hbm [shape: f32[2,2,128], index: 0, kind: input, shape index: {}, may-alias: {0,2}]   ;;  %s640_s1 = inlined_call_operand.vmem [shape: f32[2,128], index: 1, kind: input, shape index: {}]   ;;  %s641_s2 = inlined_call_operand.hbm [shape: f32[2,2,128], index: 2, kind: output, shape index: {}, may-alias: {0,2}]  }
   0x1   :  { %9 = vsyncpa [#allocation3 + $0x1], 0 }
   0x2   :  { %10 = vsyncpa [#allocation4], 0 }
   0x3   :  { %12 = vsyncpa [#allocation4 + $0x1], 0  ;;  %s516_s9 = smov 0   ;;  %s518_s10 = smov 0  }
   0x4   :  { %s520_s11 = smov 0   ;;  %s522_s12 = smov 0  }
   0x5   :  { %s524_s13 = smov 0   ;;  %s526_s14 = smov 0  }
   0x6 LB: > { %s311_s15 = sadd.s32 4294967295, %s499_s14   ;;  %s312_s16 = sadd.s32 4294967294, %s499_s14   ;;  %s499_s14 = sphi %s526_s14, %s18_s14   ;;  %s495_s13 = sphi %s524_s13, %s650_s13   ;;  %s491_s12 = sphi %s522_s12, %s649_s12   ;;  %s487_s11 = sphi %s520_s11, %s648_s11   ;;  %s483_s10 = sphi %s518_s10, %s647_s10   ;;  %s479_s9 = sphi %s516_s9, %s646_s9  }
   0x7   : > { %s27_s17 = sadd.s32 1, %s495_s13  ;;  %s39_s18 = sadd.s32 1, %s487_s11 }
   0x8   : > { %p28_p0 = scmp.ge.s32.totalorder %s27_s17, 2  ;;  %p46_p1 = scmp.ne.s32.totalorder %s487_s11, %s483_s10 }
   0x9   : > { %p47_p2 = scmp.eq.s32.totalorder %s499_s14, 0  ;;  %p52_p3 = scmp.ne.s32.totalorder %s483_s10, %s479_s9 }
   0xa   : > { %s652_s17 = smov (%p28_p0, %s27_s17), 0  ;;  %p53_p5 = scmp.eq.s32.totalorder %s311_s15, 0 }
   0xb   : > { %p557_p4 = por %p47_p2, %p46_p1  ;;  %s34_s20 = ssub.s32 %s495_s13, %s652_s17 }
   0xc   : > { %p104_p6 = scmp.eq.s32.totalorder %s311_s15, 1  ;;  %p37_p7 = scmp.eq.s32.totalorder %s34_s20, 0 }
   0xd   : > { %p563_p8 = por %p53_p5, %p52_p3  ;;  %p110_p10 = scmp.eq.s32.totalorder %s312_s16, 1 }
   0xe   : > { %p567_p9 = por %p104_p6, %p46_p1  ;;  %p315_p12 = scmp.ge.s32.totalorder %s499_s14, 2 }
   0xf   : > { %s572_s23 = scalar_select %p37_p7, %s487_s11, %s39_s18  }
  0x10   : > { %p574_p11 = por %p110_p10, %p52_p3  ;;  %p337_p13 = scmp.lt.s32.totalorder %s499_s14, 2 }
  0x11   : > { %s137_s25 = sand.u32 1, %s487_s11   ;;  %s317_s27 = sshll.u32 %s495_s13, 1 }
  0x12   : > { %s316_s26 = sshll.u32 %s137_s25, 1  ;;  %s146_s30 = scalar_lea.hbm %s639_s0, %s317_s27 }
  0x13   : > { %s141_s3 = scalar_lea.vmem [#allocation2], %s316_s26  ;;  %s148_s5 = sshll.u32 %s146_s30, 4  ;;  %s149_s5 = int_to_ptr.hbm [resolvable:$true] %s148_s5 }
  0x14   : > { %s150_s4 = sshll.u32 %s141_s3, 4  ;;  %p330_p0 = pnand %p337_p13, %p557_p4  ;;  %s151_s4 = int_to_ptr.vmem [resolvable:$true] %s150_s4 }
  0x15   : > { %p318_p1 = scmp.ge.s32.totalorder %s499_s14, 1  ;;  %p155_p2 = scmp.lt.s32.totalorder %s499_s14, 3 }
  0x16   : > { %s138_s6 = scalar_lea.sflag [#allocation3], %s137_s25 }
  0x17   : > { %332 = dma.hbm_to_vmem [thread:$0]  (!%p330_p0), %s149_s5, 32, %s151_s4, %s138_s6  }
  0x18   : > { %p156_p3 = pnand %p318_p1, %p155_p2 }
  0x19   : > { %s590_s7 = sand.u32 (!%p156_p3), 1, %s483_s10  }
  0x1a   : > { %159 = sbr.rel (%p156_p3) target bundleno = 47 (0x2f), region = 28  ;;  %s319_s8 = sshll.u32 (!%p156_p3), %s590_s7, 1 }
  0x1b   : > { %s162_s15 = scalar_lea.sflag (!%p156_p3), [#allocation3], %s590_s7  ;;  %s165_s16 = scalar_lea.vmem (!%p156_p3), [#allocation2], %s319_s8 }
  0x1f   : > { %470 = dma.done.wait (%p563_p8), %s162_s15, 32  }
  0x20   : > { %472 = vsyncadd (%p563_p8), %s162_s15, 4294967264  ;;  %s322_s18 = sshll.u32 %s491_s12, 1  ;;  %s190_s26 = scalar_lea.vmem [#allocation5], %s319_s8  ;;  %v195_v0 = vld [vmem:[%s165_s16] sm:$0x3] }
  0x21   : > { %s211_s25 = scalar_lea.hbm %s641_s2, %s322_s18  ;;  %s213_s27 = sshll.u32 %s190_s26, 4  ;;  %v196_v1 = vld [vmem:[%s640_s1] sm:$0x3]  ;;  %s214_s27 = int_to_ptr.vmem [resolvable:$true] %s213_s27 }
  0x22   : > { %s215_s28 = sshll.u32 %s211_s25, 4  ;;  %v197_v2 = vadd.f32 %v196_v1, %v195_v0  ;;  %s200_s21 = scalar_lea.sflag [#allocation4], %s590_s7  ;;  %s216_s28 = int_to_ptr.hbm [resolvable:$true] %s215_s28 }
  0x23   : > { %s431_s3 = sshra.s32 %s216_s28, 4  ;;  %s437_s6 = scalar_lea.hbm %s641_s2, 4  ;;  %s432_s3 = int_to_ptr.hbm [resolvable:$true] %s431_s3 }
  0x24   : > { %198 = vst [vmem:[%s190_s26] sm:$0x3] %v197_v2  ;;  %s433_s12 = scalar_lea.hbm %s432_s3, 2  ;;  %p438_p7 = scmp.lt.s32.totalorder %s432_s3, %s641_s2 }
  0x25   : > { %p434_p4 = scmp.ne.s32.totalorder %s432_s3, %s433_s12  ;;  %p439_p8 = scmp.lt.s32.totalorder %s437_s6, %s433_s12 }
  0x27   : > { %p435_p5 = pnand %p434_p4, %p567_p9  ;;  %p440_p10 = por %p439_p8, %p438_p7 }
  0x29   : > { %p436_p6 = pneg %p435_p5 }
  0x2b   : > { %p441_p13 = pnand %p440_p10, %p436_p6 }
  0x2d   : > { %444 = shalt.err (!%p441_p13)
}
  0x2e   : > { %327 = dma.vmem_to_hbm [thread:$0]  (%p567_p9), %s214_s27, 32, %s216_s28, %s200_s21  }
  0x2f PF: > { %s227_s7 = sand.u32 1, %s479_s9   ;;  %p334_p0 = pnand %p315_p12, %p574_p11 }
  0x30   : > { %s228_s16 = scalar_lea.sflag [#allocation4], %s227_s7 }
  0x31   : > { %p335_p1 = pneg %p334_p0 }
  0x33   : > { %474 = dma.done.wait (%p335_p1), %s228_s16, 32  }
  0x34   : > { %476 = vsyncadd (%p335_p1), %s228_s16, 4294967264  ;;  %s18_s14 = sadd.s32 1, %s499_s14   ;;  %s646_s9 = smov %s483_s10 }
  0x35   : > { %p15_p2 = scmp.ge.s32.totalorder %s18_s14, 4   ;;  %s647_s10 = smov %s487_s11 }
  0x36   : > { %s648_s11 = smov %s572_s23  ;;  %s649_s12 = smov %s495_s13 }
  0x37   : > { %s650_s13 = smov %s652_s17  ;;  %17 = sbr.rel (!%p15_p2) target bundleno = 6 (0x6), region = 76 }
  0x3c   :  { %234 = vsyncpa [#allocation3], 1 }
  0x3d   :  { %236 = vsyncpa [#allocation3 + $0x1], 1 }
  0x3e   :  { %237 = vsyncpa [#allocation4], 1 }
  0x3f   :  { %239 = vsyncpa [#allocation4 + $0x1], 1 }

</bundles_post_ra>
